<compile_context>
chip_gen: v7x
topology: tpu7x:2x2x1
jax: 0.10.0
libtpu: 0.0.40
codegen_flags: <defaults>
</compile_context>

<pallas_src>
import functools

import jax
import jax.numpy as jnp
from jax.experimental import pallas as pl
from jax.experimental.pallas import tpu as pltpu


def _affine_grid_sample_kernel(theta_ref, x_ref, o_ref, *, H, W, C, TILE_P):
    """One (batch element, output-pixel tile) per grid step.

    theta_ref: SMEM (6*B,)  flattened 2x3 affine rows [t00..t02, t10..t12] per b
    x_ref:     VMEM (1, C*H, W)    input image, channel-major rows (x[c,h,:])
    o_ref:     VMEM (1, C, TILE_P) output pixels p = h_out*W + w_out, this tile
    """
    b = pl.program_id(0)
    pt = pl.program_id(1)

    t00 = theta_ref[6 * b + 0]
    t01 = theta_ref[6 * b + 1]
    t02 = theta_ref[6 * b + 2]
    t10 = theta_ref[6 * b + 3]
    t11 = theta_ref[6 * b + 4]
    t12 = theta_ref[6 * b + 5]

    # ---- lane-dense coordinate math over this tile of output pixels --------
    # Global flat output index p = h_out * W + w_out, on the lane axis.
    p_i = jax.lax.broadcasted_iota(jnp.int32, (1, TILE_P), 1) + pt * TILE_P
    p_f = p_i.astype(jnp.float32)
    # f32 divide + floor is exact for any realistic image size (P < ~2^23).
    h_f = jnp.floor(p_f / W)               # output row
    w_f = p_f - h_f * W                    # output column

    # affine_grid base coordinates (align_corners=True): linspace(-1, 1, size)
    xs = 2.0 * w_f / (W - 1) - 1.0
    ys = 2.0 * h_f / (H - 1) - 1.0

    # grid[..., 0] = x-coord, grid[..., 1] = y-coord  (theta @ [x, y, 1])
    gx = t00 * xs + t01 * ys + t02
    gy = t10 * xs + t11 * ys + t12

    # Unnormalize (align_corners=True): ((coord + 1) / 2) * (size - 1)
    ix = (gx + 1.0) * (0.5 * (W - 1))
    iy = (gy + 1.0) * (0.5 * (H - 1))

    x0f = jnp.floor(ix)
    y0f = jnp.floor(iy)
    x0 = x0f.astype(jnp.int32)
    y0 = y0f.astype(jnp.int32)
    wx1 = ix - x0f
    wx0 = 1.0 - wx1
    wy1 = iy - y0f
    wy0 = 1.0 - wy1

    # ---- factored bilinear interpolation matrices ---------------------------
    # Column matrix Cx (W, TILE_P) and row matrix Ry (H, TILE_P).  OOB corners
    # (padding_mode='zeros') never match the [0, size) iota => zero weight.
    zero = jnp.float32(0.0)
    iota_w = jax.lax.broadcasted_iota(jnp.int32, (W, TILE_P), 0)
    cx = (jnp.where(iota_w == x0, wx0, zero)
          + jnp.where(iota_w == x0 + 1, wx1, zero))
    iota_h = jax.lax.broadcasted_iota(jnp.int32, (H, TILE_P), 0)
    ry = (jnp.where(iota_h == y0, wy0, zero)
          + jnp.where(iota_h == y0 + 1, wy1, zero))

    # ---- stage A (MXU): contract the input width axis -----------------------
    # V[c*H + h, p] = sum_w x[c, h, w] * Cx[w, p]
    lhs = x_ref[0]                                        # (C*H, W)
    v = jnp.dot(lhs, cx.astype(lhs.dtype),
                preferred_element_type=jnp.float32)       # (C*H, TILE_P)

    # ---- stage B (VPU/XLU): weighted sum over the input height axis ---------
    # out[c, p] = sum_h Ry[h, p] * V[c*H + h, p]
    rows = []
    for c in range(C):                                    # C is small & static
        vc = v[c * H:(c + 1) * H, :]                      # (H, TILE_P)
        rows.append(jnp.sum(vc * ry, axis=0, keepdims=True))
    out = jnp.concatenate(rows, axis=0)                   # (C, TILE_P)
    o_ref[0] = out.astype(o_ref.dtype)


def pallas_affine_grid_sample(x, theta):
    """x: (B, C, H, W), theta: (B, 2, 3) -> (B, C, H, W) bilinear affine warp."""
    B, C, H, W = x.shape
    if H < 2 or W < 2:
        raise ValueError("H and W must be >= 2 (align_corners normalization).")
    P = H * W
    itemsize = jnp.dtype(x.dtype).itemsize

    # Output-pixel tile: multiple of 128 lanes (unmasked stores) and sized so
    # the (C*H, TILE_P) f32 stage-A intermediate stays comfortably in VMEM.
    v_budget = 8 * 1024 * 1024
    cap = (v_budget // (C * H * 4)) // 128 * 128
    cap = max(128, min(2048, cap))
    if P <= cap:
        tile_p = ((P + 127) // 128) * 128
    else:
        tile_p = cap
    p_pad = ((P + tile_p - 1) // tile_p) * tile_p
    n_tiles = p_pad // tile_p

    x_rows = x.reshape(B, C * H, W)                     # x[c,h,:] on row c*H+h
    theta_flat = theta.reshape(B * 6).astype(jnp.float32)

    # Scoped-VMEM limit from the actual footprint (blocks double-buffered,
    # intermediates counted once), with 2x margin and a 16 MiB floor.
    block_bytes = 2 * (C * H * W + C * tile_p) * itemsize
    interm_bytes = 4 * (C * H * tile_p + (H + W) * tile_p + 16 * tile_p)
    vmem_limit = int(min(64 * 1024 * 1024,
                         max(16 * 1024 * 1024, 2 * (block_bytes + interm_bytes))))

    out = pl.pallas_call(
        functools.partial(_affine_grid_sample_kernel,
                          H=H, W=W, C=C, TILE_P=tile_p),
        out_shape=jax.ShapeDtypeStruct((B, C, p_pad), x.dtype),
        grid=(B, n_tiles),
        in_specs=[
            pl.BlockSpec(memory_space=pltpu.MemorySpace.SMEM),    # theta (6B,)
            # Full image block; index constant along the p axis => stays
            # resident while that image's output tiles are produced.
            pl.BlockSpec((1, C * H, W), lambda b, p: (b, 0, 0)),
        ],
        out_specs=pl.BlockSpec((1, C, tile_p), lambda b, p: (b, 0, p)),
        compiler_params=pltpu.CompilerParams(
            dimension_semantics=("parallel", "parallel"),
            vmem_limit_bytes=vmem_limit),
    )(theta_flat, x_rows)

    return out[:, :, :P].reshape(B, C, H, W)


def _softplus(x):
    return jnp.logaddexp(x, 0.0)


def uniform_aug_theta(width_param, key, batch_size, trans_scale=0.1,
                      dtype=jnp.float32):
    """Glue: sample weights, build Lie-algebra generators, expm -> (B, 2, 3)."""
    # torch.rand(bs, 6) replaced by jax.random.uniform with an explicit key.
    weights = jax.random.uniform(key, (batch_size, 6), dtype=dtype)
    width = _softplus(width_param.astype(dtype))
    weights = weights * width - width / 2.0

    w0, w1, w2, w3, w4, w5 = [weights[:, i] for i in range(6)]
    zeros = jnp.zeros((batch_size,), dtype)
    ts = trans_scale
    # G[b] matches generate(): sum_k weights[b,k] * g_k
    row0 = jnp.stack([w3 + w4, -w2 + w5, w0 * ts], axis=-1)
    row1 = jnp.stack([w2 + w5, w3 - w4, w1 * ts], axis=-1)
    row2 = jnp.stack([zeros, zeros, zeros], axis=-1)
    G = jnp.stack([row0, row1, row2], axis=-2)            # (B, 3, 3)

    A = jax.vmap(jax.scipy.linalg.expm)(G)                # batched 3x3 expm
    return A[:, :2, :]                                    # (B, 2, 3)


def uniform_aug_forward(x, width_param, key, trans_scale=0.1):
    theta = uniform_aug_theta(width_param, key, x.shape[0], trans_scale,
                              dtype=x.dtype)
    return pallas_affine_grid_sample(x, theta)


# ----------------------- pure-JAX reference (for checking) -----------------
def reference_affine_grid_sample(x, theta):
    B, C, H, W = x.shape
    xs = jnp.linspace(-1.0, 1.0, W)
    ys = jnp.linspace(-1.0, 1.0, H)
    yy, xx = jnp.meshgrid(ys, xs, indexing="ij")
    base = jnp.stack([xx, yy, jnp.ones_like(xx)], axis=-1)        # (H, W, 3)
    grid = jnp.einsum("bij,hwj->bhwi", theta, base)               # (B, H, W, 2)
    gx, gy = grid[..., 0], grid[..., 1]
    ix = (gx + 1.0) * 0.5 * (W - 1)
    iy = (gy + 1.0) * 0.5 * (H - 1)
    x0 = jnp.floor(ix)
    y0 = jnp.floor(iy)
    x1 = x0 + 1
    y1 = y0 + 1
    wx1 = ix - x0
    wx0 = 1.0 - wx1
    wy1 = iy - y0
    wy0 = 1.0 - wy1

    def gather(xi, yi):
        xi_i = xi.astype(jnp.int32)
        yi_i = yi.astype(jnp.int32)
        valid = (xi_i >= 0) & (xi_i < W) & (yi_i >= 0) & (yi_i < H)
        xi_c = jnp.clip(xi_i, 0, W - 1)
        yi_c = jnp.clip(yi_i, 0, H - 1)
        v = jax.vmap(lambda img, yyc, xxc: img[:, yyc, xxc])(x, yi_c, xi_c)
        return v * valid[:, None, :, :].astype(x.dtype)

    out = (gather(x0, y0) * (wy0 * wx0)[:, None]
           + gather(x1, y0) * (wy0 * wx1)[:, None]
           + gather(x0, y1) * (wy1 * wx0)[:, None]
           + gather(x1, y1) * (wy1 * wx1)[:, None])
    return out


if __name__ == "__main__":
    key = jax.random.PRNGKey(0)
    k_x, k_w, k_x2, k_w2 = jax.random.split(key, 4)

    width_param = jnp.zeros((6,), jnp.float32)   # nn.Parameter(torch.zeros(6))

    # Primary check: B=2, C=4, 16x16 (P = 256, lane-aligned).
    B, C, H, W = 2, 4, 16, 16
    x = jax.random.normal(k_x, (B, C, H, W), dtype=jnp.float32)
    theta = uniform_aug_theta(width_param, k_w, B, trans_scale=0.1)
    out = jax.block_until_ready(pallas_affine_grid_sample(x, theta))
    ref = reference_affine_grid_sample(x, theta)
    assert out.shape == (B, C, H, W)
    assert out.dtype == x.dtype
    assert jnp.allclose(out, ref, rtol=1e-4, atol=1e-4), (
        float(jnp.max(jnp.abs(out - ref))))

    # Secondary check: exercises the lane-padding path (P = 192 -> 256 lanes).
    B2, C2, H2, W2 = 1, 3, 8, 24
    x2 = jax.random.normal(k_x2, (B2, C2, H2, W2), dtype=jnp.float32)
    theta2 = uniform_aug_theta(width_param, k_w2, B2, trans_scale=0.1)
    out2 = jax.block_until_ready(pallas_affine_grid_sample(x2, theta2))
    ref2 = reference_affine_grid_sample(x2, theta2)
    assert out2.shape == (B2, C2, H2, W2)
    assert jnp.allclose(out2, ref2, rtol=1e-4, atol=1e-4), (
        float(jnp.max(jnp.abs(out2 - ref2))))

    print("KERNEL_OK")
</pallas_src>

<mosaic_0001>
module attributes {stable_mosaic.version = 11 : i64} {
  func.func @_affine_grid_sample_kernel(%arg0: i32, %arg1: i32, %arg2: memref<12xf32, #tpu.memory_space<smem>>, %arg3: memref<1x64x16xf32, #tpu.memory_space<vmem>>, %arg4: memref<1x4x256xf32, #tpu.memory_space<vmem>>) attributes {dimension_semantics = [#tpu.dimension_semantics<parallel>, #tpu.dimension_semantics<parallel>], iteration_bounds = array<i64: 2, 1>, scalar_prefetch = 0 : i64, scratch_operands = 0 : i64, tpu.core_type = #tpu.core_type<tc>, window_params = [{transform_indices = @transform_0, window_bounds = array<i64: 12>}, {transform_indices = @transform_1, window_bounds = array<i64: 1, 64, 16>}, {transform_indices = @transform_2, window_bounds = array<i64: 1, 4, 256>}]} {
    %c6_i32 = arith.constant 6 : i32
    %0 = arith.muli %c6_i32, %arg0 : i32
    %c0_i32 = arith.constant 0 : i32
    %1 = arith.addi %0, %c0_i32 : i32
    %2 = arith.index_cast %1 : i32 to index
    %3 = memref.load %arg2[%2] : memref<12xf32, #tpu.memory_space<smem>>
    %c6_i32_0 = arith.constant 6 : i32
    %4 = arith.muli %c6_i32_0, %arg0 : i32
    %c1_i32 = arith.constant 1 : i32
    %5 = arith.addi %4, %c1_i32 : i32
    %6 = arith.index_cast %5 : i32 to index
    %7 = memref.load %arg2[%6] : memref<12xf32, #tpu.memory_space<smem>>
    %c6_i32_1 = arith.constant 6 : i32
    %8 = arith.muli %c6_i32_1, %arg0 : i32
    %c2_i32 = arith.constant 2 : i32
    %9 = arith.addi %8, %c2_i32 : i32
    %10 = arith.index_cast %9 : i32 to index
    %11 = memref.load %arg2[%10] : memref<12xf32, #tpu.memory_space<smem>>
    %c6_i32_2 = arith.constant 6 : i32
    %12 = arith.muli %c6_i32_2, %arg0 : i32
    %c3_i32 = arith.constant 3 : i32
    %13 = arith.addi %12, %c3_i32 : i32
    %14 = arith.index_cast %13 : i32 to index
    %15 = memref.load %arg2[%14] : memref<12xf32, #tpu.memory_space<smem>>
    %c6_i32_3 = arith.constant 6 : i32
    %16 = arith.muli %c6_i32_3, %arg0 : i32
    %c4_i32 = arith.constant 4 : i32
    %17 = arith.addi %16, %c4_i32 : i32
    %18 = arith.index_cast %17 : i32 to index
    %19 = memref.load %arg2[%18] : memref<12xf32, #tpu.memory_space<smem>>
    %c6_i32_4 = arith.constant 6 : i32
    %20 = arith.muli %c6_i32_4, %arg0 : i32
    %c5_i32 = arith.constant 5 : i32
    %21 = arith.addi %20, %c5_i32 : i32
    %22 = arith.index_cast %21 : i32 to index
    %23 = memref.load %arg2[%22] : memref<12xf32, #tpu.memory_space<smem>>
    %24 = tpu.iota {dimensions = array<i32: 1>} : vector<1x256xi32>
    %c256_i32 = arith.constant 256 : i32
    %25 = arith.muli %arg1, %c256_i32 : i32
    %26 = vector.broadcast %25 : i32 to vector<1x256xi32>
    %27 = arith.addi %24, %26 : vector<1x256xi32>
    %28 = arith.sitofp %27 : vector<1x256xi32> to vector<1x256xf32>
    %cst = arith.constant 1.600000e+01 : f32
    %29 = vector.broadcast %cst : f32 to vector<1x256xf32>
    %30 = arith.divf %28, %29 : vector<1x256xf32>
    %31 = math.floor %30 : vector<1x256xf32>
    %cst_5 = arith.constant 1.600000e+01 : f32
    %32 = vector.broadcast %cst_5 : f32 to vector<1x256xf32>
    %33 = arith.mulf %31, %32 : vector<1x256xf32>
    %34 = arith.subf %28, %33 : vector<1x256xf32>
    %cst_6 = arith.constant 2.000000e+00 : f32
    %35 = vector.broadcast %cst_6 : f32 to vector<1x256xf32>
    %36 = arith.mulf %35, %34 : vector<1x256xf32>
    %cst_7 = arith.constant 1.500000e+01 : f32
    %37 = vector.broadcast %cst_7 : f32 to vector<1x256xf32>
    %38 = arith.divf %36, %37 : vector<1x256xf32>
    %cst_8 = arith.constant 1.000000e+00 : f32
    %39 = vector.broadcast %cst_8 : f32 to vector<1x256xf32>
    %40 = arith.subf %38, %39 : vector<1x256xf32>
    %cst_9 = arith.constant 2.000000e+00 : f32
    %41 = vector.broadcast %cst_9 : f32 to vector<1x256xf32>
    %42 = arith.mulf %41, %31 : vector<1x256xf32>
    %cst_10 = arith.constant 1.500000e+01 : f32
    %43 = vector.broadcast %cst_10 : f32 to vector<1x256xf32>
    %44 = arith.divf %42, %43 : vector<1x256xf32>
    %cst_11 = arith.constant 1.000000e+00 : f32
    %45 = vector.broadcast %cst_11 : f32 to vector<1x256xf32>
    %46 = arith.subf %44, %45 : vector<1x256xf32>
    %47 = vector.broadcast %3 : f32 to vector<1x256xf32>
    %48 = arith.mulf %47, %40 : vector<1x256xf32>
    %49 = vector.broadcast %7 : f32 to vector<1x256xf32>
    %50 = arith.mulf %49, %46 : vector<1x256xf32>
    %51 = arith.addf %48, %50 : vector<1x256xf32>
    %52 = vector.broadcast %11 : f32 to vector<1x256xf32>
    %53 = arith.addf %51, %52 : vector<1x256xf32>
    %54 = vector.broadcast %15 : f32 to vector<1x256xf32>
    %55 = arith.mulf %54, %40 : vector<1x256xf32>
    %56 = vector.broadcast %19 : f32 to vector<1x256xf32>
    %57 = arith.mulf %56, %46 : vector<1x256xf32>
    %58 = arith.addf %55, %57 : vector<1x256xf32>
    %59 = vector.broadcast %23 : f32 to vector<1x256xf32>
    %60 = arith.addf %58, %59 : vector<1x256xf32>
    %cst_12 = arith.constant 1.000000e+00 : f32
    %61 = vector.broadcast %cst_12 : f32 to vector<1x256xf32>
    %62 = arith.addf %53, %61 : vector<1x256xf32>
    %cst_13 = arith.constant 7.500000e+00 : f32
    %63 = vector.broadcast %cst_13 : f32 to vector<1x256xf32>
    %64 = arith.mulf %62, %63 : vector<1x256xf32>
    %cst_14 = arith.constant 1.000000e+00 : f32
    %65 = vector.broadcast %cst_14 : f32 to vector<1x256xf32>
    %66 = arith.addf %60, %65 : vector<1x256xf32>
    %cst_15 = arith.constant 7.500000e+00 : f32
    %67 = vector.broadcast %cst_15 : f32 to vector<1x256xf32>
    %68 = arith.mulf %66, %67 : vector<1x256xf32>
    %69 = math.floor %64 : vector<1x256xf32>
    %70 = math.floor %68 : vector<1x256xf32>
    %71 = arith.fptosi %69 : vector<1x256xf32> to vector<1x256xi32>
    %72 = arith.fptosi %70 : vector<1x256xf32> to vector<1x256xi32>
    %73 = arith.subf %64, %69 : vector<1x256xf32>
    %cst_16 = arith.constant 1.000000e+00 : f32
    %74 = vector.broadcast %cst_16 : f32 to vector<1x256xf32>
    %75 = arith.subf %74, %73 : vector<1x256xf32>
    %76 = arith.subf %68, %70 : vector<1x256xf32>
    %cst_17 = arith.constant 1.000000e+00 : f32
    %77 = vector.broadcast %cst_17 : f32 to vector<1x256xf32>
    %78 = arith.subf %77, %76 : vector<1x256xf32>
    %79 = tpu.iota {dimensions = array<i32: 0>} : vector<16x256xi32>
    %80 = vector.broadcast %71 : vector<1x256xi32> to vector<16x256xi32>
    %81 = arith.cmpi eq, %79, %80 : vector<16x256xi32>
    %cst_18 = arith.constant 0.000000e+00 : f32
    %82 = vector.shape_cast %75 : vector<1x256xf32> to vector<1x256xf32>
    %83 = vector.broadcast %82 : vector<1x256xf32> to vector<16x256xf32>
    %84 = vector.broadcast %cst_18 : f32 to vector<16x256xf32>
    %85 = arith.select %81, %83, %84 : vector<16x256xi1>, vector<16x256xf32>
    %c1_i32_19 = arith.constant 1 : i32
    %86 = vector.broadcast %c1_i32_19 : i32 to vector<1x256xi32>
    %87 = arith.addi %71, %86 : vector<1x256xi32>
    %88 = vector.broadcast %87 : vector<1x256xi32> to vector<16x256xi32>
    %89 = arith.cmpi eq, %79, %88 : vector<16x256xi32>
    %cst_20 = arith.constant 0.000000e+00 : f32
    %90 = vector.shape_cast %73 : vector<1x256xf32> to vector<1x256xf32>
    %91 = vector.broadcast %90 : vector<1x256xf32> to vector<16x256xf32>
    %92 = vector.broadcast %cst_20 : f32 to vector<16x256xf32>
    %93 = arith.select %89, %91, %92 : vector<16x256xi1>, vector<16x256xf32>
    %94 = arith.addf %85, %93 : vector<16x256xf32>
    %95 = tpu.iota {dimensions = array<i32: 0>} : vector<16x256xi32>
    %96 = vector.broadcast %72 : vector<1x256xi32> to vector<16x256xi32>
    %97 = arith.cmpi eq, %95, %96 : vector<16x256xi32>
    %cst_21 = arith.constant 0.000000e+00 : f32
    %98 = vector.shape_cast %78 : vector<1x256xf32> to vector<1x256xf32>
    %99 = vector.broadcast %98 : vector<1x256xf32> to vector<16x256xf32>
    %100 = vector.broadcast %cst_21 : f32 to vector<16x256xf32>
    %101 = arith.select %97, %99, %100 : vector<16x256xi1>, vector<16x256xf32>
    %c1_i32_22 = arith.constant 1 : i32
    %102 = vector.broadcast %c1_i32_22 : i32 to vector<1x256xi32>
    %103 = arith.addi %72, %102 : vector<1x256xi32>
    %104 = vector.broadcast %103 : vector<1x256xi32> to vector<16x256xi32>
    %105 = arith.cmpi eq, %95, %104 : vector<16x256xi32>
    %cst_23 = arith.constant 0.000000e+00 : f32
    %106 = vector.shape_cast %76 : vector<1x256xf32> to vector<1x256xf32>
    %107 = vector.broadcast %106 : vector<1x256xf32> to vector<16x256xf32>
    %108 = vector.broadcast %cst_23 : f32 to vector<16x256xf32>
    %109 = arith.select %105, %107, %108 : vector<16x256xi1>, vector<16x256xf32>
    %110 = arith.addf %101, %109 : vector<16x256xf32>
    %c0 = arith.constant 0 : index
    %c0_24 = arith.constant 0 : index
    %c0_25 = arith.constant 0 : index
    %111 = vector.load %arg3[%c0, %c0_24, %c0_25] : memref<1x64x16xf32, #tpu.memory_space<vmem>>, vector<1x64x16xf32>
    %112 = vector.shape_cast %111 : vector<1x64x16xf32> to vector<64x16xf32>
    %cst_26 = arith.constant dense<0.000000e+00> : vector<64x256xf32>
    %113 = tpu.matmul %112, %94, %cst_26 {dimension_numbers = #tpu.dot_dimension_numbers<[1], [0], [0], [1], [0, 0, 1, 1], [], []>} : vector<64x16xf32>, vector<16x256xf32>, vector<64x256xf32> -> vector<64x256xf32>
    %114 = vector.extract_strided_slice %113 {offsets = [0, 0], sizes = [16, 256], strides = [1, 1]} : vector<64x256xf32> to vector<16x256xf32>
    %115 = arith.mulf %114, %110 : vector<16x256xf32>
    %cst_27 = arith.constant dense<0.000000e+00> : vector<256xf32>
    %116 = vector.multi_reduction <add>, %115, %cst_27 [0] : vector<16x256xf32> to vector<256xf32>
    %117 = vector.shape_cast %116 : vector<256xf32> to vector<1x256xf32>
    %118 = vector.extract_strided_slice %113 {offsets = [16, 0], sizes = [16, 256], strides = [1, 1]} : vector<64x256xf32> to vector<16x256xf32>
    %119 = arith.mulf %118, %110 : vector<16x256xf32>
    %cst_28 = arith.constant dense<0.000000e+00> : vector<256xf32>
    %120 = vector.multi_reduction <add>, %119, %cst_28 [0] : vector<16x256xf32> to vector<256xf32>
    %121 = vector.shape_cast %120 : vector<256xf32> to vector<1x256xf32>
    %122 = vector.extract_strided_slice %113 {offsets = [32, 0], sizes = [16, 256], strides = [1, 1]} : vector<64x256xf32> to vector<16x256xf32>
    %123 = arith.mulf %122, %110 : vector<16x256xf32>
    %cst_29 = arith.constant dense<0.000000e+00> : vector<256xf32>
    %124 = vector.multi_reduction <add>, %123, %cst_29 [0] : vector<16x256xf32> to vector<256xf32>
    %125 = vector.shape_cast %124 : vector<256xf32> to vector<1x256xf32>
    %126 = vector.extract_strided_slice %113 {offsets = [48, 0], sizes = [16, 256], strides = [1, 1]} : vector<64x256xf32> to vector<16x256xf32>
    %127 = arith.mulf %126, %110 : vector<16x256xf32>
    %cst_30 = arith.constant dense<0.000000e+00> : vector<256xf32>
    %128 = vector.multi_reduction <add>, %127, %cst_30 [0] : vector<16x256xf32> to vector<256xf32>
    %129 = vector.shape_cast %128 : vector<256xf32> to vector<1x256xf32>
    %130 = tpu.concatenate %117, %121, %125, %129 in 0 : vector<1x256xf32>, vector<1x256xf32>, vector<1x256xf32>, vector<1x256xf32> -> vector<4x256xf32>
    %c0_31 = arith.constant 0 : index
    %c0_32 = arith.constant 0 : index
    %c0_33 = arith.constant 0 : index
    %131 = vector.load %arg4[%c0_31, %c0_32, %c0_33] : memref<1x4x256xf32, #tpu.memory_space<vmem>>, vector<1x4x256xf32>
    %132 = vector.shape_cast %131 : vector<1x4x256xf32> to vector<4x256xf32>
    %133 = vector.shape_cast %130 : vector<4x256xf32> to vector<1x4x256xf32>
    tpu.vector_store %arg4[%c0_31, %c0_32, %c0_33], %133 {strides = array<i32>} : memref<1x4x256xf32, #tpu.memory_space<vmem>>, vector<1x4x256xf32>,
    return
  }
  func.func @transform_0(%arg0: i32, %arg1: i32) -> i32 {
    %c0_i32 = arith.constant 0 : i32
    %c0_i32_0 = arith.constant 0 : i32
    return %c0_i32 : i32
  }
  func.func @transform_1(%arg0: i32, %arg1: i32) -> (i32, i32, i32) {
    %c0_i32 = arith.constant 0 : i32
    %c0_i32_0 = arith.constant 0 : i32
    %c0_i32_1 = arith.constant 0 : i32
    return %arg0, %c0_i32, %c0_i32_0 : i32, i32, i32
  }
  func.func @transform_2(%arg0: i32, %arg1: i32) -> (i32, i32, i32) {
    %c0_i32 = arith.constant 0 : i32
    %c0_i32_0 = arith.constant 0 : i32
    return %arg0, %c0_i32, %arg1 : i32, i32, i32
  }
}

</mosaic_0001>

<bundles_post_ra>
// kernel: tpu_custom_call.1
= control target key start
LH: loop header
LB: loop body
LE: loop exit
PB: predicated region body
PF: predicated region fallthrough
CT: control target
= control target key end

     0   :  { %7 = vsyncpa [#allocation4], 0  ;;  %s1082_s0 = inlined_call_operand.vmem [shape: f32[12], index: 0, kind: input, shape index: {}]   ;;  %s1083_s1 = inlined_call_operand.vmem [shape: f32[2,64,16], index: 1, kind: input, shape index: {}]   ;;  %s1084_s2 = inlined_call_operand.hbm [shape: f32[2,4,256], index: 2, kind: output, shape index: {}]  }
   0x1   :  { %8 = vsyncpa [#allocation3], 0 }
   0x2   :  { %10 = vsyncpa [#allocation3 + $0x1], 0  ;;  %s865_s9 = smov 0   ;;  %s867_s10 = smov 0  }
   0x3   :  { %s869_s11 = smov 0   ;;  %s871_s12 = smov 0  }
   0x4   :  { %s873_s13 = smov 0   ;;  %s875_s14 = smov 0  }
   0x5 LB: > { %s638_s15 = sadd.s32 4294967295, %s845_s14   ;;  %s639_s16 = sadd.s32 4294967294, %s845_s14   ;;  %s845_s14 = sphi %s875_s14, %s16_s14   ;;  %s841_s13 = sphi %s873_s13, %s1093_s13   ;;  %s837_s12 = sphi %s871_s12, %s1092_s12   ;;  %s833_s11 = sphi %s869_s11, %s1091_s11   ;;  %s829_s10 = sphi %s867_s10, %s1090_s10   ;;  %s825_s9 = sphi %s865_s9, %s1089_s9  }
   0x6   : > { %s28_s17 = sadd.s32 1, %s841_s13  ;;  %s84_s18 = sadd.s32 1, %s833_s11 }
   0x7   : > { %p30_p0 = scmp.ge.s32.totalorder %s28_s17, 2  ;;  %p94_p1 = scmp.ne.s32.totalorder %s833_s11, %s829_s10 }
   0x8   : > { %p95_p2 = scmp.eq.s32.totalorder %s638_s15, 1  ;;  %p100_p3 = scmp.ne.s32.totalorder %s829_s10, %s825_s9 }
   0x9   : > { %s1095_s17 = smov (%p30_p0, %s28_s17), 0  ;;  %p101_p5 = scmp.eq.s32.totalorder %s639_s16, 1 }
   0xa   : > { %p905_p4 = por %p95_p2, %p94_p1  ;;  %s79_s20 = ssub.s32 %s841_s13, %s1095_s17 }
   0xb   : > { %p640_p6 = scmp.ge.s32.totalorder %s845_s14, 1  ;;  %p82_p7 = scmp.eq.s32.totalorder %s79_s20, 0 }
   0xc   : > { %p912_p8 = por %p101_p5, %p100_p3  ;;  %p108_p9 = scmp.lt.s32.totalorder %s845_s14, 3 }
   0xd   : > { %s918_s22 = scalar_select %p82_p7, %s833_s11, %s84_s18  }
   0xe   : > { %p920_p10 = pnand %p640_p6, %p108_p9  ;;  %p924_p11 = scmp.eq.s32.totalorder %s638_s15, 0 }
   0xf   : > { %s121_s27 = sshll.u32 %s1082_s0, 4  ;;  %s122_s27 = int_to_ptr.vmem [resolvable:$true] %s121_s27 }
  0x10   : > { %p687_p12 = pneg %p920_p10  ;;  %s748_s28 = scalar_lea.vmem %s122_s27, 16 }
  0x11   : > { %p749_p0 = scmp.ne.s32.totalorder %s122_s27, %s748_s28  ;;  %p756_p5 = scmp.lt.s32.totalorder %s122_s27, %s122_s27 }
  0x12   : > { %p688_p13 = pnand %p924_p11, %p687_p12  ;;  %p757_p6 = scmp.lt.s32.totalorder %s748_s28, %s748_s28 }
  0x14   : > { %p750_p1 = pneg %p688_p13  ;;  %p758_p7 = por %p757_p6, %p756_p5 }
  0x16   : > { %p751_p2 = pnand %p750_p1, %p749_p0 }
  0x18   : > { %p752_p3 = pneg %p751_p2 }
  0x1a   : > { %p759_p9 = pnand %p758_p7, %p752_p3 }
  0x1c   : > { %762 = shalt.err (!%p759_p9)
}
  0x1d   : > { %s847_s29 = smov [#allocation2]   ;;  %142 = sbr.rel (%p920_p10) target bundleno = 349 (0x15d), region = 28 }
  0x1e   : > { %690 = dma.vmem_to_smem (!%p688_p13), %s122_s27, 16, %s847_s29, [#allocation4]  }
  0x24   : > { %816 = dma.done.wait (%p924_p11), [#allocation4], 16  }
  0x25   : > { %818 = vsyncadd (%p924_p11), [#allocation4], 4294967280 }
  0x26   : > { %148 = sfence }
  0x27   : > { %s942_s30 = smul.u32 6, %s837_s12  ;;  %v183_v0 = vlaneseq  ;;  %v848_v1 = vmov 0.0   ;;  %p165_p10 = scmp.lt.s32.totalorder %s837_s12, 1  ;;  %vm315_vm8 = vcmask 130048  }
  0x28   : > { %404 = vmatprep.mubr.f32.mxu0 %v848_v1  ;;  %428 = vmatprep.mubr.f32.mxu1 %v848_v1  ;;  %s162_s29 = sand.u32 1, %s829_s10  }
  0x29   : > { %v184_v2 = vand.u32 127, %v183_v0  ;;  %s173_s3 = sadd.s32 1, %s942_s30  ;;  %s179_s4 = sadd.s32 4, %s942_s30  ;;  %v978_v48 = vshrl.u32 %v183_v0, 7 }
  0x2a   : > { %s177_s5 = sadd.s32 3, %s942_s30  ;;  %s949_s6 = sld [smem:[#allocation2 + %s179_s4]] }
  0x2b   : > { %v185_v3 = vadd.s32 128, %v184_v2  ;;  %v190_v4 = vcvt.s32.f32 %v184_v2  ;;  %s951_s7 = sld [smem:[#allocation2 + %s173_s3]]  ;;  %s175_s16 = sadd.s32 2, %s942_s30  ;;  %v981_v53 = vadd.s32 8, %v978_v48 }
  0x2c   : > { %s954_s8 = sld [smem:[#allocation2 + %s942_s30]]  ;;  %s181_s18 = sadd.s32 5, %s942_s30 }
  0x2d   : > { %v191_v5 = vcvt.s32.f32 %v185_v3  ;;  %v193_v6 = vmul.f32 0.0625, %v190_v4  ;;  %s956_s15 = sld [smem:[#allocation2 + %s177_s5]]  ;;  %s1026_s30 = sshll.u32 %s162_s29, 3 }
  0x2e   : > { %s960_s20 = sld [smem:[#allocation2 + %s175_s16]]  ;;  %s666_s3 = sshll.u32 %s837_s12, 7 }
  0x2f   : > { %v194_v7 = vmul.f32 0.0625, %v191_v5  ;;  %v195_v8 = vfloor.f32 %v193_v6  ;;  %s962_s23 = sld [smem:[#allocation2 + %s181_s18]]  ;;  %s164_s4 = scalar_lea.vmem [#allocation5], %s1026_s30 }
  0x30   : > { %v228_v18 = vstv %s949_s6  ;;  %s166_s24 = scalar_select %p165_p10, %s837_s12, 1 }
  0x31   : > { %v196_v9 = vfloor.f32 %v194_v7  ;;  %v197_v10 = vmul.f32 16.0, %v195_v8  ;;  %v208_v11 = vmul.f32 2.0, %v195_v8  ;;  %v217_v20 = vstv %s951_s7  ;;  %s556_s5 = sshll.u32 %s164_s4, 4  ;;  %s849_s16 = smov [#allocation5]   ;;  %s1035_s5 = int_to_ptr.vmem [resolvable:$true] %s556_s5 }
  0x32   : > { %v214_v25 = vstv %s954_s8  ;;  %s665_s25 = sshll.u32 %s166_s24, 6  ;;  %s1033_s8 = scalar_lea.hbm %s1084_s2, %s666_s3 }
  0x33   : > { %v198_v12 = vmul.f32 16.0, %v196_v9  ;;  %v209_v13 = vmul.f32 2.0, %v196_v9  ;;  %v199_v14 = vsub.f32 %v190_v4, %v197_v10  ;;  %v210_v15 = vmul.f32 0.06666667, %v208_v11  ;;  %s169_s28 = scalar_lea.vmem %s1083_s1, %s665_s25  ;;  %s763_s12 = scalar_lea.vmem %s1035_s5, 128 }
  0x34   : > { %v225_v26 = vstv %s956_s15  ;;  %v222_v36 = vstv %s960_s20  ;;  %s540_s15 = scalar_lea.sflag [#allocation3], %s162_s29  ;;  %p764_p11 = scmp.ne.s32.totalorder %s1035_s5, %s763_s12 }
  0x35   : > { %v200_v16 = vsub.f32 %v191_v5, %v198_v12  ;;  %v211_v17 = vmul.f32 0.06666667, %v209_v13  ;;  %v201_v19 = vmul.f32 2.0, %v199_v14  ;;  %v650_v21 = vadd.f32 -1.0, %v210_v15  ;;  %v307_v15 = vld [vmem:[%s169_s28] sm:$0xff]  ;;  %s767_s18 = sshll.u32 %s849_s16, 4  ;;  %s768_s18 = int_to_ptr.vmem [resolvable:$false] %s767_s18 }
  0x36   : > { %v233_v37 = vstv %s962_s23  ;;  %p765_p12 = pnand %p764_p11, %p905_p4  ;;  %s769_s20 = scalar_lea.vmem %s768_s18, 256 }
  0x37   : > { %v202_v22 = vmul.f32 2.0, %v200_v16  ;;  %v651_v23 = vadd.f32 -1.0, %v211_v17  ;;  %v204_v24 = vmul.f32 0.06666667, %v201_v19  ;;  %v229_v27 = vmul.f32 %v650_v21, %v228_v18  ;;  %v311_v16 = vld [vmem:[%s169_s28 + $0x20] sm:$0xff]  ;;  %v308_v17 = vld [vmem:[%s169_s28 + $0x8] sm:$0xff]  ;;  %p770_p0 = scmp.lt.s32.totalorder %s1035_s5, %s768_s18  ;;  %p771_p1 = scmp.lt.s32.totalorder %s769_s20, %s763_s12 }
  0x38   : > { %v218_v31 = vmul.f32 %v650_v21, %v217_v20  ;;  %v309_v19 = vld [vmem:[%s169_s28 + $0x10] sm:$0xff]  ;;  %v310_v21 = vld [vmem:[%s169_s28 + $0x18] sm:$0xff]  ;;  %p766_p13 = pneg %p765_p12 }
  0x39   : > { %v205_v28 = vmul.f32 0.06666667, %v202_v22  ;;  %v968_v29 = vmul.f32 %v651_v23, %v228_v18  ;;  %v648_v30 = vadd.f32 -1.0, %v204_v24  ;;  %v219_v33 = vmul.f32 %v651_v23, %v217_v20  ;;  %v312_v18 = vld [vmem:[%s169_s28 + $0x28] sm:$0xff]  ;;  %v313_v20 = vld [vmem:[%s169_s28 + $0x30] sm:$0xff]  ;;  %v314_v22 = vld [vmem:[%s169_s28 + $0x38] sm:$0xff]  ;;  %p772_p2 = por %p771_p1, %p770_p0 }
  0x3b   : > { %v649_v32 = vadd.f32 -1.0, %v205_v28  ;;  %v215_v34 = vmul.f32 %v648_v30, %v214_v25  ;;  %v226_v35 = vmul.f32 %v648_v30, %v225_v26  ;;  %p773_p3 = pnand %p772_p2, %p766_p13 }
  0x3d   : > { %v216_v38 = vmul.f32 %v649_v32, %v214_v25  ;;  %v972_v39 = vmul.f32 %v649_v32, %v225_v26  ;;  %v220_v40 = vadd.f32 %v218_v31, %v215_v34  ;;  %v231_v41 = vadd.f32 %v229_v27, %v226_v35 }
  0x3f   : > { %v221_v42 = vadd.f32 %v219_v33, %v216_v38  ;;  %v223_v43 = vadd.f32 %v222_v36, %v220_v40  ;;  %v976_v44 = vadd.f32 %v233_v37, %v231_v41  ;;  %v232_v23 = vadd.f32 %v968_v29, %v972_v39 }
  0x41   : > { %v224_v45 = vadd.f32 %v222_v36, %v221_v42  ;;  %v236_v46 = vadd.f32 1.0, %v223_v43  ;;  %v235_v24 = vadd.f32 %v233_v37, %v232_v23  ;;  %v240_v25 = vadd.f32 1.0, %v976_v44 }
  0x43   : > { %v237_v47 = vadd.f32 1.0, %v224_v45  ;;  %v238_v49 = vmul.f32 7.5, %v236_v46  ;;  %v241_v26 = vadd.f32 1.0, %v235_v24  ;;  %v242_v27 = vmul.f32 7.5, %v240_v25 }
  0x45   : > { %v239_v50 = vmul.f32 7.5, %v237_v47  ;;  %v244_v51 = vfloor.f32 %v238_v49  ;;  %v243_v28 = vmul.f32 7.5, %v241_v26  ;;  %v246_v30 = vfloor.f32 %v242_v27 }
  0x47   : > { %v245_v52 = vfloor.f32 %v239_v50  ;;  %v673_v54 = vtrunc.f32 %v244_v51  ;;  %v252_v55 = vsub.f32 %v238_v49, %v244_v51  ;;  %v247_v31 = vfloor.f32 %v243_v28 }
  0x48   : > { %v677_v32 = vtrunc.f32 %v246_v30  ;;  %v256_v35 = vsub.f32 %v242_v27, %v246_v30 }
  0x49   : > { %v675_v56 = vtrunc.f32 %v245_v52  ;;  %v253_v57 = vsub.f32 %v239_v50, %v245_v52  ;;  %v674_v58 = vcvt.f32.s32 %v673_v54  ;;  %v254_v59 = vsub.f32 1.0, %v252_v55 }
  0x4a   : > { %v678_v33 = vcvt.f32.s32 %v677_v32  ;;  %v257_v38 = vsub.f32 %v243_v28, %v247_v31  ;;  %v258_v41 = vsub.f32 1.0, %v256_v35 }
  0x4b   : > { %v676_v60 = vcvt.f32.s32 %v675_v56  ;;  %v255_v61 = vsub.f32 1.0, %v253_v57  ;;  %vm263_vm0 = vcmp.eq.s32.totalorder %v978_v48, %v674_v58  ;;  %vm265_vm1 = vcmp.eq.s32.totalorder %v981_v53, %v674_v58 }
  0x4c   : > { %v267_v62 = vsel %vm263_vm0, %v254_v59, 0.0  ;;  %v271_v63 = vadd.s32 1, %v674_v58  ;;  %v269_v2 = vsel %vm265_vm1, %v254_v59, 0.0  ;;  %v293_v36 = vadd.s32 1, %v678_v33 }
  0x4d   : > { %vm264_vm2 = vcmp.eq.s32.totalorder %v978_v48, %v676_v60  ;;  %vm266_vm3 = vcmp.eq.s32.totalorder %v981_v53, %v676_v60  ;;  %v272_v0 = vadd.s32 1, %v676_v60  ;;  %vm285_vm9 = vcmp.eq.s32.totalorder %v978_v48, %v678_v33 }
  0x4e   : > { %v268_v3 = vsel %vm264_vm2, %v255_v61, 0.0  ;;  %v270_v4 = vsel %vm266_vm3, %v255_v61, 0.0  ;;  %vm273_vm4 = vcmp.eq.s32.totalorder %v978_v48, %v271_v63  ;;  %vm275_vm5 = vcmp.eq.s32.totalorder %v981_v53, %v271_v63 }
  0x4f   : > { %vm274_vm6 = vcmp.eq.s32.totalorder %v978_v48, %v272_v0  ;;  %vm276_vm7 = vcmp.eq.s32.totalorder %v981_v53, %v272_v0  ;;  %v277_v5 = vsel %vm273_vm4, %v252_v55, 0.0  ;;  %v279_v6 = vsel %vm275_vm5, %v252_v55, 0.0 }
  0x50   : > { %v278_v7 = vsel %vm274_vm6, %v253_v57, 0.0  ;;  %v280_v8 = vsel %vm276_vm7, %v253_v57, 0.0  ;;  %v281_v9 = vadd.f32 %v277_v5, %v267_v62  ;;  %v283_v10 = vadd.f32 %v279_v6, %v269_v2 }
  0x51   : > { %v282_v11 = vadd.f32 %v278_v7, %v268_v3  ;;  %v284_v12 = vadd.f32 %v280_v8, %v270_v4  ;;  %vm295_vm10 = vcmp.eq.s32.totalorder %v978_v48, %v293_v36  ;;  %v259_v29 = vsub.f32 1.0, %v257_v38 }
  0x52   : > { %v669_v13 = vpack.c.bf16 %v283_v10, %v281_v9  ;;  %v289_v37 = vsel %vm285_vm9, %v258_v41, 0.0  ;;  %v299_v39 = vsel %vm295_vm10, %v256_v35, 0.0  ;;  %vm287_vm13 = vcmp.eq.s32.totalorder %v981_v53, %v678_v33 }
  0x53   : > { %v667_v14 = vpack.c.bf16 %v284_v12, %v282_v11  ;;  %vm297_vm14 = vcmp.eq.s32.totalorder %v981_v53, %v293_v36  ;;  %v303_v44 = vadd.f32 %v299_v39, %v289_v37  ;;  %v291_v46 = vsel %vm287_vm13, %v258_v41, 0.0 }
  0x54   : > { %v301_v47 = vsel %vm297_vm14, %v256_v35, 0.0  ;;  %vm525_vm1 = vcmask 1040384   ;;  %vm528_vm2 = vcmask 1041408   ;;  %vm531_vm3 = vcmask 1042432  }
  0x55   : > { %668 = vmatprep.subr.bf16.mxu0 %v667_v14  ;;  %671 = vmatprep.subr.bf16.mxu1 %v667_v14  ;;  %v305_v57 = vadd.f32 %v301_v47, %v291_v46 }
  0x56   : > { %670 = vmatpush1.bf16.msra.mxu0 %v669_v13  ;;  %672 = vmatpush1.bf16.msra.mxu1 %v669_v13 }
  0x59   : > { %652 = vmatmul.mubr.msk.f32.vlgmr.msra.gmra.mrb[0].mxu0 %vm315_vm8, %v307_v15  ;;  %656 = vmatmul.mubr.msk.f32.vlgmr.msra.gmra.mrb[0].mxu1 %vm315_vm8, %v311_v16 }
  0x5a   : > { %410 = vmatprep.mubr.f32.mxu0 %v848_v1  ;;  %434 = vmatprep.mubr.f32.mxu1 %v848_v1 }
  0x5d   : > { %653 = vmatmul.mubr.msk.f32.gmra.mrb[2].mxu0 %vm315_vm8, %v308_v17  ;;  %657 = vmatmul.mubr.msk.f32.gmra.mrb[2].mxu1 %vm315_vm8, %v312_v18 }
  0x5e   : > { %416 = vmatprep.mubr.f32.mxu0 %v848_v1  ;;  %440 = vmatprep.mubr.f32.mxu1 %v848_v1 }
  0x61   : > { %654 = vmatmul.mubr.msk.f32.gmra.mrb[4].mxu0 %vm315_vm8, %v309_v19  ;;  %658 = vmatmul.mubr.msk.f32.gmra.mrb[4].mxu1 %vm315_vm8, %v313_v20 }
  0x62   : > { %422 = vmatprep.mubr.f32.mxu0 %v848_v1  ;;  %446 = vmatprep.mubr.f32.mxu1 %v848_v1  ;;  %v679_v1 = vtrunc.f32 %v247_v31 }
  0x64   : > { %v680_v34 = vcvt.f32.s32 %v679_v1 }
  0x65   : > { %655 = vmatmul.mubr.msk.f32.gmra.mrb[6].mxu0 %vm315_vm8, %v310_v21  ;;  %659 = vmatmul.mubr.msk.f32.gmra.mrb[6].mxu1 %vm315_vm8, %v314_v22 }
  0x66   : > { %v294_v40 = vadd.s32 1, %v680_v34  ;;  %vm286_vm11 = vcmp.eq.s32.totalorder %v978_v48, %v680_v34  ;;  %vm288_vm15 = vcmp.eq.s32.totalorder %v981_v53, %v680_v34 }
  0x67   : > { %v290_v42 = vsel %vm286_vm11, %v259_v29, 0.0  ;;  %v292_v49 = vsel %vm288_vm15, %v259_v29, 0.0 }
  0x68   : > { %vm296_vm12 = vcmp.eq.s32.totalorder %v978_v48, %v294_v40  ;;  %vm298_vm0 = vcmp.eq.s32.totalorder %v981_v53, %v294_v40 }
  0x69   : > { %v300_v43 = vsel %vm296_vm12, %v257_v38, 0.0  ;;  %v302_v50 = vsel %vm298_vm0, %v257_v38, 0.0 }
  0x6a   : > { %v304_v45 = vadd.f32 %v300_v43, %v290_v42  ;;  %v306_v60 = vadd.f32 %v302_v50, %v292_v49 }
 0x12c   : > { %v406_v51 = vpop.f32.mrb[0].mxu0  ;;  %v430_v48 = vpop.f32.mrb[0].mxu1 }
 0x12d   : > { %v453_v52 = vmul.f32 %v406_v51, %v303_v44  ;;  %v408_v54 = vpop.f32.mrb[1].mxu0  ;;  %v489_v55 = vmul.f32 %v430_v48, %v303_v44  ;;  %v432_v56 = vpop.f32.mrb[1].mxu1 }
 0x12e   : > { %v454_v58 = vmul.f32 %v408_v54, %v304_v45  ;;  %v490_v59 = vmul.f32 %v432_v56, %v304_v45 }
 0x130   : > { %v412_v61 = vpop.f32.mrb[2].mxu0  ;;  %v436_v62 = vpop.f32.mrb[2].mxu1 }
 0x131   : > { %v455_v63 = vmul.f32 %v412_v61, %v305_v57  ;;  %v491_v53 = vmul.f32 %v436_v62, %v305_v57  ;;  %v414_v0 = vpop.f32.mrb[3].mxu0  ;;  %v438_v2 = vpop.f32.mrb[3].mxu1 }
 0x132   : > { %v456_v3 = vmul.f32 %v414_v0, %v306_v60  ;;  %v492_v4 = vmul.f32 %v438_v2, %v306_v60 }
 0x133   : > { %v457_v5 = vadd.f32 %v455_v63, %v453_v52  ;;  %v493_v6 = vadd.f32 %v491_v53, %v489_v55 }
 0x134   : > { %v464_v7 = vadd.f32 %v456_v3, %v454_v58  ;;  %v500_v8 = vadd.f32 %v492_v4, %v490_v59  ;;  %v418_v9 = vpop.f32.mrb[4].mxu0  ;;  %v442_v10 = vpop.f32.mrb[4].mxu1 }
 0x135   : > { %v458_v11 = vrot.slane %v457_v5, 4  ;;  %v494_v12 = vrot.slane %v493_v6, 4  ;;  %v471_v13 = vmul.f32 %v418_v9, %v303_v44  ;;  %v420_v14 = vpop.f32.mrb[5].mxu0  ;;  %v507_v15 = vmul.f32 %v442_v10, %v303_v44  ;;  %v444_v16 = vpop.f32.mrb[5].mxu1 }
 0x136   : > { %v465_v17 = vrot.slane %v464_v7, 4  ;;  %v501_v18 = vrot.slane %v500_v8, 4  ;;  %v472_v19 = vmul.f32 %v420_v14, %v304_v45  ;;  %v508_v20 = vmul.f32 %v444_v16, %v304_v45 }
 0x137   : > { %v459_v21 = vadd.f32 %v458_v11, %v457_v5  ;;  %v495_v22 = vadd.f32 %v494_v12, %v493_v6 }
 0x138   : > { %v466_v23 = vadd.f32 %v465_v17, %v464_v7  ;;  %v424_v24 = vpop.f32.mrb[6].mxu0  ;;  %v448_v25 = vpop.f32.mrb[6].mxu1  ;;  %v502_v26 = vadd.f32 %v501_v18, %v500_v8 }
 0x139   : > { %v473_v27 = vmul.f32 %v424_v24, %v305_v57  ;;  %v509_v28 = vmul.f32 %v448_v25, %v305_v57  ;;  %v426_v30 = vpop.f32.mrb[7].mxu0  ;;  %v450_v31 = vpop.f32.mrb[7].mxu1  ;;  %v460_v33 = vrot.slane %v459_v21, 2  ;;  %v496_v36 = vrot.slane %v495_v22, 2 }
 0x13a   : > { %v474_v32 = vmul.f32 %v426_v30, %v306_v60  ;;  %v510_v1 = vmul.f32 %v450_v31, %v306_v60  ;;  %v467_v38 = vrot.slane %v466_v23, 2  ;;  %v503_v29 = vrot.slane %v502_v26, 2 }
 0x13b   : > { %v475_v34 = vadd.f32 %v473_v27, %v471_v13  ;;  %v511_v35 = vadd.f32 %v509_v28, %v507_v15  ;;  %v461_v44 = vadd.f32 %v460_v33, %v459_v21  ;;  %v497_v47 = vadd.f32 %v496_v36, %v495_v22 }
 0x13c   : > { %v482_v40 = vadd.f32 %v474_v32, %v472_v19  ;;  %v518_v41 = vadd.f32 %v510_v1, %v508_v20  ;;  %v468_v49 = vadd.f32 %v467_v38, %v466_v23  ;;  %v504_v48 = vadd.f32 %v503_v29, %v502_v26 }
 0x13d   : > { %v476_v37 = vrot.slane %v475_v34, 4  ;;  %v512_v39 = vrot.slane %v511_v35, 4  ;;  %v462_v57 = vrot.slane %v461_v44, 1  ;;  %v498_v60 = vrot.slane %v497_v47, 1 }
 0x13e   : > { %v483_v42 = vrot.slane %v482_v40, 4  ;;  %v519_v43 = vrot.slane %v518_v41, 4  ;;  %v469_v61 = vrot.slane %v468_v49, 1  ;;  %v505_v53 = vrot.slane %v504_v48, 1 }
 0x13f   : > { %v477_v45 = vadd.f32 %v476_v37, %v475_v34  ;;  %v513_v46 = vadd.f32 %v512_v39, %v511_v35  ;;  %v463_v5 = vadd.f32 %v462_v57, %v461_v44  ;;  %v499_v7 = vadd.f32 %v498_v60, %v497_v47 }
 0x140   : > { %v484_v50 = vadd.f32 %v483_v42, %v482_v40  ;;  %v520_v51 = vadd.f32 %v519_v43, %v518_v41  ;;  %v470_v8 = vadd.f32 %v469_v61, %v468_v49  ;;  %v506_v10 = vadd.f32 %v505_v53, %v504_v48 }
 0x141   : > { %v478_v52 = vrot.slane %v477_v45, 2  ;;  %v514_v54 = vrot.slane %v513_v46, 2 }
 0x142   : > { %v485_v55 = vrot.slane %v484_v50, 2  ;;  %v521_v56 = vrot.slane %v520_v51, 2 }
 0x143   : > { %v479_v58 = vadd.f32 %v478_v52, %v477_v45  ;;  %v515_v59 = vadd.f32 %v514_v54, %v513_v46 }
 0x144   : > { %v486_v62 = vadd.f32 %v485_v55, %v484_v50  ;;  %v522_v63 = vadd.f32 %v521_v56, %v520_v51 }
 0x145   : > { %v480_v0 = vrot.slane %v479_v58, 1  ;;  %v516_v2 = vrot.slane %v515_v59, 1 }
 0x146   : > { %v487_v3 = vrot.slane %v486_v62, 1  ;;  %v523_v4 = vrot.slane %v522_v63, 1 }
 0x147   : > { %v481_v6 = vadd.f32 %v480_v0, %v479_v58  ;;  %v517_v11 = vadd.f32 %v516_v2, %v515_v59 }
 0x148   : > { %v488_v9 = vadd.f32 %v487_v3, %v486_v62  ;;  %v524_v13 = vadd.f32 %v523_v4, %v522_v63 }
 0x149   : > { %v526_v12 = vsel %vm525_vm1, %v463_v5, %v481_v6 }
 0x14a   : > { %v527_v14 = vsel %vm525_vm1, %v470_v8, %v488_v9  ;;  %v529_v15 = vsel %vm528_vm2, %v526_v12, %v499_v7 }
 0x14b   : > { %v530_v16 = vsel %vm528_vm2, %v527_v14, %v506_v10  ;;  %v532_v17 = vsel %vm531_vm3, %v529_v15, %v517_v11 }
 0x14c   : > { %v533_v18 = vsel %vm531_vm3, %v530_v16, %v524_v13 }
 0x14d   : > { %v536_v19 = vcombine.low %v532_v17, %v533_v18 }
 0x14f   : > { %538 = vst [vmem:[%s164_s4] sm:$0xff] %v536_v19 }
 0x150   : > { %776 = shalt.err (!%p773_p3)
}
 0x151   : > { %s777_s23 = scalar_lea.hbm %s1033_s8, 128  ;;  %s781_s26 = scalar_lea.hbm %s1084_s2, 256 }
 0x152   : > { %p778_p5 = scmp.ne.s32.totalorder %s1033_s8, %s777_s23  ;;  %p782_p9 = scmp.lt.u32.totalorder %s1033_s8, %s1084_s2 }
 0x153   : > { %p783_p10 = scmp.lt.u32.totalorder %s781_s26, %s777_s23  ;;  %p785_p12 = scmp.lt.u32.totalorder %s777_s23, %s1033_s8 }
 0x154   : > { %p779_p6 = pnand %p778_p5, %p905_p4 }
 0x155   : > { %p784_p11 = por %p783_p10, %p782_p9 }
 0x156   : > { %p780_p7 = pneg %p779_p6 }
 0x157   : > { %p786_p13 = por %p785_p12, %p784_p11 }
 0x159   : > { %p787_p0 = pnand %p786_p13, %p780_p7 }
 0x15b   : > { %790 = shalt.err (!%p787_p0)
}
 0x15c   : > { %685 = dma.vmem_to_hbm [thread:$0]  (%p905_p4), %s1035_s5, 128, %s1033_s8, %s540_s15  }
 0x15d PF: > { %p697_p1 = scmp.ge.s32.totalorder %s845_s14, 2  ;;  %s568_s29 = sand.u32 1, %s825_s9  }
 0x15e   : > { %s569_s30 = scalar_lea.sflag [#allocation3], %s568_s29 }
 0x15f   : > { %p692_p2 = pnand %p697_p1, %p912_p8 }
 0x161   : > { %820 = dma.done.wait (!%p692_p2), %s569_s30, 128  }
 0x162   : > { %822 = vsyncadd (!%p692_p2), %s569_s30, 4294967168  ;;  %s16_s14 = sadd.s32 1, %s845_s14   ;;  %s1089_s9 = smov %s829_s10 }
 0x163   : > { %p13_p3 = scmp.ge.s32.totalorder %s16_s14, 4   ;;  %s1090_s10 = smov %s833_s11 }
 0x164   : > { %s1091_s11 = smov %s918_s22  ;;  %s1092_s12 = smov %s841_s13 }
 0x165   : > { %s1093_s13 = smov %s1095_s17  ;;  %15 = sbr.rel (!%p13_p3) target bundleno = 5 (0x5), region = 68 }
 0x16c   :  { %574 = vsyncpa [#allocation3], 1 }
 0x16d   :  { %576 = vsyncpa [#allocation3 + $0x1], 1 }
 0x16e   :  { %577 = vsyncpa [#allocation4], 1 }
 0x16f   :  { %579 = vsyncpa [#allocation4 + $0x1], 1 }

</bundles_post_ra>
